<compile_context>
chip_gen: v5e
topology: v5e:2x2
jax: 0.10.0
libtpu: 0.0.40
codegen_flags: <defaults>
</compile_context>

<pallas_src>
import math

import jax
import jax.numpy as jnp
from jax.experimental import pallas as pl
from jax.experimental.pallas import tpu as pltpu


def _round_up(n: int, m: int) -> int:
    return ((n + m - 1) // m) * m


def _bf16_elementwise_ok() -> bool:
    """bf16 VPU/EUP exists on v6e/v7x; keep f32 elementwise on v5e and older."""
    try:
        kind = jax.devices()[0].device_kind.lower()
    except Exception:
        return False
    return ("v6" in kind) or ("v7" in kind)


def mlp_discriminator_kernel(x_ref, w1_ref, b1_ref, w2_ref, b2_ref,
                             w3_ref, b3_ref, o_ref):
    mm_dtype = w1_ref.dtype          # matmul operand dtype (bf16 or f32)
    ew_dtype = b1_ref.dtype          # elementwise dtype (bf16 on v6e/v7x, else f32)

    # x block is [TB, IN] straight from HBM; cast to the matmul dtype in-kernel.
    x = x_ref[...].astype(mm_dtype)

    # Layer 1 (feature-major): w1 [H, IN] . x^T -> [H, TB]; batch on the lane axis.
    h = jax.lax.dot_general(
        w1_ref[...], x,
        dimension_numbers=(((1,), (1,)), ((), ())),
        preferred_element_type=jnp.float32)
    h = jnp.tanh(h.astype(ew_dtype) + b1_ref[...])

    # Layer 2: w2 [H, H] @ h [H, TB] -> [H, TB].
    h = jnp.dot(w2_ref[...], h.astype(mm_dtype),
                preferred_element_type=jnp.float32)
    h = jnp.tanh(h.astype(ew_dtype) + b2_ref[...])

    # Head: w3 [1, H] @ h [H, TB] -> [1, TB]; scalar bias from SMEM; sigmoid in f32.
    logits = jnp.dot(w3_ref[...], h.astype(mm_dtype),
                     preferred_element_type=jnp.float32)
    o_ref[...] = jax.nn.sigmoid(logits + b3_ref[0]).astype(o_ref.dtype)


def mlp_discriminator_forward(x, params, *, block_batch=8192, use_bf16=True,
                              bf16_elementwise=None):
    """x: [batch, 2*obs_dim + act_dim] float32 -> [batch, 1] float32."""
    w1, b1, w2, b2, w3, b3 = params
    batch, in_dim = x.shape
    hidden = w1.shape[0]

    mm_dtype = jnp.bfloat16 if use_bf16 else jnp.float32
    if bf16_elementwise is None:
        bf16_elementwise = use_bf16 and _bf16_elementwise_ok()
    ew_dtype = jnp.bfloat16 if (use_bf16 and bf16_elementwise) else jnp.float32

    # Weights/biases are tiny and VMEM-resident -> cast once in the wrapper.
    # x is intentionally NOT cast here (the kernel casts it), avoiding an extra
    # full read+write HBM pass over the dominant stream.
    w1c = w1.astype(mm_dtype)
    w2c = w2.astype(mm_dtype)
    w3c = w3.astype(mm_dtype)
    b1c = b1.astype(ew_dtype)
    b2c = b2.astype(ew_dtype)
    b3c = b3.reshape((1,)).astype(jnp.float32)

    # Batch tile: multiple of 128 (lane-dense [1, TB] output block).
    tb = max(128, min(_round_up(block_batch, 128), _round_up(batch, 128)))
    grid = (pl.cdiv(batch, tb),)     # ragged final block handled by Pallas masking

    const = lambda i: (0, 0)         # same block every step -> resident weights

    bytes_accessed = int(
        x.size * x.dtype.itemsize
        + w1c.size * w1c.dtype.itemsize + w2c.size * w2c.dtype.itemsize
        + w3c.size * w3c.dtype.itemsize
        + b1c.size * b1c.dtype.itemsize + b2c.size * b2c.dtype.itemsize + 4
        + batch * 4)
    cost = pl.CostEstimate(
        flops=2 * batch * (in_dim * hidden + hidden * hidden + hidden),
        transcendentals=batch * (2 * hidden + 1),
        bytes_accessed=bytes_accessed)

    out = pl.pallas_call(
        mlp_discriminator_kernel,
        out_shape=jax.ShapeDtypeStruct((1, batch), jnp.float32),
        grid=grid,
        in_specs=[
            pl.BlockSpec((tb, in_dim), lambda i: (i, 0)),        # x batch tile
            pl.BlockSpec((hidden, in_dim), const),               # w1 [H, IN]
            pl.BlockSpec((hidden, 1), const),                    # b1 [H, 1]
            pl.BlockSpec((hidden, hidden), const),               # w2 [H, H]
            pl.BlockSpec((hidden, 1), const),                    # b2 [H, 1]
            pl.BlockSpec((1, hidden), const),                    # w3 [1, H]
            pl.BlockSpec(memory_space=pltpu.MemorySpace.SMEM),   # b3 scalar
        ],
        out_specs=pl.BlockSpec((1, tb), lambda i: (0, i)),       # lane-dense [1, TB]
        compiler_params=pltpu.CompilerParams(
            dimension_semantics=("parallel",)),
        cost_estimate=cost,
    )(x, w1c, b1c, w2c, b2c, w3c, b3c)

    # [1, batch] -> [batch, 1] (same memory layout; callers wanting [1, batch]
    # can use the pallas output directly).
    return out.reshape(batch, 1)


def init_params(key, obs_dim, act_dim, hidden_dim):
    """Mimics torch.nn.Linear default init (U(-1/sqrt(fan_in), +)), with the
    head weight/bias scaled by 0.1 as in the PyTorch module.

    Weights are kept in the PyTorch [out_features, in_features] layout, which
    is exactly the feature-major layout the kernel consumes; biases are stored
    as [out_features, 1] columns (broadcast along the batch/lane axis).
    """
    in_dim = 2 * obs_dim + act_dim
    keys = jax.random.split(key, 6)

    def linear(kw, kb, fan_in, out_dim):
        bound = 1.0 / math.sqrt(fan_in)
        w = jax.random.uniform(kw, (out_dim, fan_in), jnp.float32, -bound, bound)
        b = jax.random.uniform(kb, (out_dim, 1), jnp.float32, -bound, bound)
        return w, b

    w1, b1 = linear(keys[0], keys[1], in_dim, hidden_dim)       # [H, IN], [H, 1]
    w2, b2 = linear(keys[2], keys[3], hidden_dim, hidden_dim)   # [H, H],  [H, 1]
    w3, b3 = linear(keys[4], keys[5], hidden_dim, 1)            # [1, H],  [1, 1]
    return (w1, b1, w2, b2, w3 * 0.1, b3 * 0.1)


def reference_forward(x, params):
    """Pure-JAX f32 reference for correctness checks (PyTorch semantics)."""
    w1, b1, w2, b2, w3, b3 = params
    h = jnp.tanh(x @ w1.T + b1[:, 0])
    h = jnp.tanh(h @ w2.T + b2[:, 0])
    return jax.nn.sigmoid(h @ w3.T + b3[:, 0])


if __name__ == "__main__":
    obs_dim, act_dim, hidden_dim = 8, 4, 32
    batch = 300                     # not a multiple of any tile -> ragged final block
    in_dim = 2 * obs_dim + act_dim  # 20

    key = jax.random.PRNGKey(0)
    k_x, k_p = jax.random.split(key)
    x = jax.random.normal(k_x, (batch, in_dim), dtype=jnp.float32)
    params = init_params(k_p, obs_dim, act_dim, hidden_dim)

    ref = reference_forward(x, params)

    # Default config (bf16 matmuls; bf16 elementwise auto-enabled on v6e/v7x):
    # a single 384-row tile covering a ragged 300-row batch (partial-block path,
    # no wrapper-side padding of x).
    out = mlp_discriminator_forward(x, params)
    out = jax.block_until_ready(out)
    assert out.shape == (batch, 1), out.shape
    assert jnp.allclose(out, ref, atol=2e-2, rtol=2e-2), \
        float(jnp.max(jnp.abs(out - ref)))

    # Small tile -> multi-step batch grid (3 tiles, last one ragged).
    out_multi = mlp_discriminator_forward(x, params, block_batch=128)
    out_multi = jax.block_until_ready(out_multi)
    assert jnp.allclose(out_multi, ref, atol=2e-2, rtol=2e-2), \
        float(jnp.max(jnp.abs(out_multi - ref)))

    # Full-precision path matches the reference tightly.
    out_f32 = mlp_discriminator_forward(x, params, block_batch=128, use_bf16=False)
    out_f32 = jax.block_until_ready(out_f32)
    assert jnp.allclose(out_f32, ref, atol=1e-5, rtol=1e-5), \
        float(jnp.max(jnp.abs(out_f32 - ref)))

    print("KERNEL_OK")
</pallas_src>

<mosaic_0001>
module attributes {stable_mosaic.version = 11 : i64} {
  func.func @mlp_discriminator_kernel(%arg0: i32, %arg1: memref<384x20xf32, #tpu.memory_space<vmem>>, %arg2: memref<32x20xbf16, #tpu.memory_space<vmem>>, %arg3: memref<32x1xf32, #tpu.memory_space<vmem>>, %arg4: memref<32x32xbf16, #tpu.memory_space<vmem>>, %arg5: memref<32x1xf32, #tpu.memory_space<vmem>>, %arg6: memref<1x32xbf16, #tpu.memory_space<vmem>>, %arg7: memref<1xf32, #tpu.memory_space<smem>>, %arg8: memref<1x384xf32, #tpu.memory_space<vmem>>) attributes {dimension_semantics = [#tpu.dimension_semantics<parallel>], iteration_bounds = array<i64: 1>, scalar_prefetch = 0 : i64, scratch_operands = 0 : i64, tpu.core_type = #tpu.core_type<tc>, window_params = [{transform_indices = @transform_0, window_bounds = array<i64: 384, 20>}, {pipeline_mode = #tpu.pipeline_mode<synchronous>, transform_indices = @transform_1, window_bounds = array<i64: 32, 20>}, {pipeline_mode = #tpu.pipeline_mode<synchronous>, transform_indices = @transform_2, window_bounds = array<i64: 32, 1>}, {pipeline_mode = #tpu.pipeline_mode<synchronous>, transform_indices = @transform_3, window_bounds = array<i64: 32, 32>}, {pipeline_mode = #tpu.pipeline_mode<synchronous>, transform_indices = @transform_4, window_bounds = array<i64: 32, 1>}, {pipeline_mode = #tpu.pipeline_mode<synchronous>, transform_indices = @transform_5, window_bounds = array<i64: 1, 32>}, {transform_indices = @transform_6, window_bounds = array<i64: 1>}, {transform_indices = @transform_7, window_bounds = array<i64: 1, 384>}]} {
    %c0 = arith.constant 0 : index
    %c0_0 = arith.constant 0 : index
    %0 = vector.load %arg1[%c0, %c0_0] : memref<384x20xf32, #tpu.memory_space<vmem>>, vector<384x20xf32>
    %1 = arith.truncf %0 : vector<384x20xf32> to vector<384x20xbf16>
    %c0_1 = arith.constant 0 : index
    %c0_2 = arith.constant 0 : index
    %2 = vector.load %arg2[%c0_1, %c0_2] : memref<32x20xbf16, #tpu.memory_space<vmem>>, vector<32x20xbf16>
    %cst = arith.constant dense<0.000000e+00> : vector<32x384xf32>
    %3 = tpu.matmul %2, %1, %cst {dimension_numbers = #tpu.dot_dimension_numbers<[1], [1], [0], [0], [0, 0, 1, 0], [], []>} : vector<32x20xbf16>, vector<384x20xbf16>, vector<32x384xf32> -> vector<32x384xf32>
    %c0_3 = arith.constant 0 : index
    %c0_4 = arith.constant 0 : index
    %4 = vector.load %arg3[%c0_3, %c0_4] : memref<32x1xf32, #tpu.memory_space<vmem>>, vector<32x1xf32>
    %5 = vector.broadcast %4 : vector<32x1xf32> to vector<32x384xf32>
    %6 = arith.addf %3, %5 : vector<32x384xf32>
    %7 = math.tanh %6 : vector<32x384xf32>
    %c0_5 = arith.constant 0 : index
    %c0_6 = arith.constant 0 : index
    %8 = vector.load %arg4[%c0_5, %c0_6] : memref<32x32xbf16, #tpu.memory_space<vmem>>, vector<32x32xbf16>
    %9 = arith.truncf %7 : vector<32x384xf32> to vector<32x384xbf16>
    %cst_7 = arith.constant dense<0.000000e+00> : vector<32x384xf32>
    %10 = tpu.matmul %8, %9, %cst_7 {dimension_numbers = #tpu.dot_dimension_numbers<[1], [0], [0], [1], [0, 0, 1, 1], [], []>} : vector<32x32xbf16>, vector<32x384xbf16>, vector<32x384xf32> -> vector<32x384xf32>
    %c0_8 = arith.constant 0 : index
    %c0_9 = arith.constant 0 : index
    %11 = vector.load %arg5[%c0_8, %c0_9] : memref<32x1xf32, #tpu.memory_space<vmem>>, vector<32x1xf32>
    %12 = vector.broadcast %11 : vector<32x1xf32> to vector<32x384xf32>
    %13 = arith.addf %10, %12 : vector<32x384xf32>
    %14 = math.tanh %13 : vector<32x384xf32>
    %c0_10 = arith.constant 0 : index
    %c0_11 = arith.constant 0 : index
    %15 = vector.load %arg6[%c0_10, %c0_11] : memref<1x32xbf16, #tpu.memory_space<vmem>>, vector<1x32xbf16>
    %16 = arith.truncf %14 : vector<32x384xf32> to vector<32x384xbf16>
    %cst_12 = arith.constant dense<0.000000e+00> : vector<1x384xf32>
    %17 = tpu.matmul %15, %16, %cst_12 {dimension_numbers = #tpu.dot_dimension_numbers<[1], [0], [0], [1], [0, 0, 1, 1], [], []>} : vector<1x32xbf16>, vector<32x384xbf16>, vector<1x384xf32> -> vector<1x384xf32>
    %c0_13 = arith.constant 0 : index
    %18 = memref.load %arg7[%c0_13] : memref<1xf32, #tpu.memory_space<smem>>
    %19 = vector.broadcast %18 : f32 to vector<1x384xf32>
    %20 = arith.addf %17, %19 : vector<1x384xf32>
    %21 = arith.negf %20 : vector<1x384xf32>
    %22 = math.exp %21 : vector<1x384xf32>
    %cst_14 = arith.constant 1.000000e+00 : f32
    %23 = vector.broadcast %cst_14 : f32 to vector<1x384xf32>
    %24 = arith.addf %23, %22 : vector<1x384xf32>
    %25 = arith.divf %23, %24 : vector<1x384xf32>
    %c0_15 = arith.constant 0 : index
    %c0_16 = arith.constant 0 : index
    %26 = vector.load %arg8[%c0_15, %c0_16] : memref<1x384xf32, #tpu.memory_space<vmem>>, vector<1x384xf32>
    tpu.vector_store %arg8[%c0_15, %c0_16], %25 {strides = array<i32>} : memref<1x384xf32, #tpu.memory_space<vmem>>, vector<1x384xf32>,
    return
  }
  func.func @transform_0(%arg0: i32) -> (i32, i32) {
    %c0_i32 = arith.constant 0 : i32
    %c0_i32_0 = arith.constant 0 : i32
    return %arg0, %c0_i32 : i32, i32
  }
  func.func @transform_1(%arg0: i32) -> (i32, i32) {
    %c0_i32 = arith.constant 0 : i32
    %c0_i32_0 = arith.constant 0 : i32
    %c0_i32_1 = arith.constant 0 : i32
    return %c0_i32, %c0_i32_0 : i32, i32
  }
  func.func @transform_2(%arg0: i32) -> (i32, i32) {
    %c0_i32 = arith.constant 0 : i32
    %c0_i32_0 = arith.constant 0 : i32
    %c0_i32_1 = arith.constant 0 : i32
    return %c0_i32, %c0_i32_0 : i32, i32
  }
  func.func @transform_3(%arg0: i32) -> (i32, i32) {
    %c0_i32 = arith.constant 0 : i32
    %c0_i32_0 = arith.constant 0 : i32
    %c0_i32_1 = arith.constant 0 : i32
    return %c0_i32, %c0_i32_0 : i32, i32
  }
  func.func @transform_4(%arg0: i32) -> (i32, i32) {
    %c0_i32 = arith.constant 0 : i32
    %c0_i32_0 = arith.constant 0 : i32
    %c0_i32_1 = arith.constant 0 : i32
    return %c0_i32, %c0_i32_0 : i32, i32
  }
  func.func @transform_5(%arg0: i32) -> (i32, i32) {
    %c0_i32 = arith.constant 0 : i32
    %c0_i32_0 = arith.constant 0 : i32
    %c0_i32_1 = arith.constant 0 : i32
    return %c0_i32, %c0_i32_0 : i32, i32
  }
  func.func @transform_6(%arg0: i32) -> i32 {
    %c0_i32 = arith.constant 0 : i32
    %c0_i32_0 = arith.constant 0 : i32
    return %c0_i32 : i32
  }
  func.func @transform_7(%arg0: i32) -> (i32, i32) {
    %c0_i32 = arith.constant 0 : i32
    %c0_i32_0 = arith.constant 0 : i32
    return %c0_i32, %arg0 : i32, i32
  }
}

</mosaic_0001>

<bundles_post_ra>
// kernel: tpu_custom_call.1
= control target key start
LH: loop header
LB: loop body
LE: loop exit
PB: predicated region body
PF: predicated region fallthrough
CT: control target
= control target key end

     0   :  { %vm139_vm0 = vcmask 162816   ;;  %s957_s0 = inlined_call_operand.vmem [shape: f32[300,20], index: 0, kind: input, shape index: {}]   ;;  %s958_s1 = inlined_call_operand.vmem [shape: bf16[32,20], index: 1, kind: input, shape index: {}]   ;;  %s959_s2 = inlined_call_operand.vmem [shape: f32[32,1], index: 2, kind: input, shape index: {}]   ;;  %s960_s3 = inlined_call_operand.vmem [shape: bf16[32,32], index: 3, kind: input, shape index: {}]   ;;  %s961_s4 = inlined_call_operand.vmem [shape: f32[32,1], index: 4, kind: input, shape index: {}]   ;;  %s962_s5 = inlined_call_operand.vmem [shape: bf16[1,32], index: 5, kind: input, shape index: {}]   ;;  %s963_s6 = inlined_call_operand.<no memory space> [shape: f32[1], index: 6, kind: input, shape index: {}]   ;;  %s964_s7 = inlined_call_operand.hbm [shape: f32[1,300], index: 7, kind: output, shape index: {}]  }
   0x1   :  { %v43_v0 = vld [vmem:[%s957_s0 + $0x70] sm:$0xff]  ;;  %v44_v1 = vld [vmem:[%s957_s0 + $0x78] sm:$0xff]  ;;  %v41_v9 = vld [vmem:[%s957_s0 + $0x60] sm:$0xff] }
   0x2   :  { %v59_v2 = vld [vmem:[%s957_s0 + $0xf0] sm:$0xff]  ;;  %v84_v3 = vpack.c.bf16 %v44_v1, %v43_v0  ;;  %v60_v4 = vld [vmem:[%s957_s0 + $0xf8] sm:$0xff]  ;;  %v42_v10 = vld [vmem:[%s957_s0 + $0x68] sm:$0xff] }
   0x3   :  { %v75_v5 = vld [vmem:[%s957_s0 + $0x170] sm:$0xff]  ;;  %v76_v6 = vld [vmem:[%s957_s0 + $0x178] sm:$0xff]  ;;  %v92_v7 = vpack.c.bf16 %v60_v4, %v59_v2  ;;  %v57_v11 = vld [vmem:[%s957_s0 + $0xe0] sm:$0xff]  ;;  %v83_v18 = vpack.c.bf16 %v42_v10, %v41_v9 }
   0x4   :  { %v100_v8 = vpack.c.bf16 %v76_v6, %v75_v5  ;;  %v168_v12 = vsel %vm139_vm0, %v84_v3, 0  ;;  %v58_v13 = vld [vmem:[%s957_s0 + $0xe8] sm:$0xff]  ;;  %v73_v14 = vld [vmem:[%s957_s0 + $0x160] sm:$0xff]  ;;  %v39_v24 = vld [vmem:[%s957_s0 + $0x50] sm:$0xff] }
   0x5   :  { %v74_v15 = vld [vmem:[%s957_s0 + $0x168] sm:$0xff]  ;;  %218 = vmatpush.bf16.xpose.msra.mxu0 %v168_v12  ;;  %v192_v16 = vsel %vm139_vm0, %v92_v7, 0  ;;  %v91_v19 = vpack.c.bf16 %v58_v13, %v57_v11  ;;  %v165_v21 = vsel %vm139_vm0, %v83_v18, 0  ;;  %v40_v25 = vld [vmem:[%s957_s0 + $0x58] sm:$0xff]  ;;  %v55_v26 = vld [vmem:[%s957_s0 + $0xd0] sm:$0xff] }
   0x6   :  { %v216_v17 = vsel %vm139_vm0, %v100_v8, 0  ;;  %237 = vmatpush.bf16.xpose.msra.mxu1 %v192_v16  ;;  %v99_v20 = vpack.c.bf16 %v74_v15, %v73_v14  ;;  %v56_v27 = vld [vmem:[%s957_s0 + $0xd8] sm:$0xff]  ;;  %v71_v28 = vld [vmem:[%s957_s0 + $0x150] sm:$0xff] }
   0x7   :  { %256 = vmatpush.bf16.xpose.msra.mxu2 %v216_v17  ;;  %v189_v22 = vsel %vm139_vm0, %v91_v19, 0  ;;  %v72_v29 = vld [vmem:[%s957_s0 + $0x158] sm:$0xff] }
   0x8   :  { %v213_v23 = vsel %vm139_vm0, %v99_v20, 0 }
   0xd   :  { %219 = vmatpush.bf16.xpose.msra.mxu0 %v165_v21 }
   0xe   :  { %13 = vsyncpa [#allocation4], 0  ;;  %238 = vmatpush.bf16.xpose.msra.mxu1 %v189_v22  ;;  %v82_v30 = vpack.c.bf16 %v40_v25, %v39_v24  ;;  %v90_v31 = vpack.c.bf16 %v56_v27, %v55_v26  ;;  %v98_v32 = vpack.c.bf16 %v72_v29, %v71_v28  ;;  %v37_v36 = vld [vmem:[%s957_s0 + $0x40] sm:$0xff]  ;;  %v38_v37 = vld [vmem:[%s957_s0 + $0x48] sm:$0xff]  ;;  %v675_v7 = vmov 0   ;;  %s537_s30 = sshll.u32 %s964_s7, 4  ;;  %s538_s30 = int_to_ptr.hbm [resolvable:$true] %s537_s30 }
   0xf   :  { %257 = vmatpush.bf16.xpose.msra.mxu2 %v213_v23  ;;  %v53_v38 = vld [vmem:[%s957_s0 + $0xc0] sm:$0xff]  ;;  %v54_v39 = vld [vmem:[%s957_s0 + $0xc8] sm:$0xff]  ;;  %v81_v42 = vpack.c.bf16 %v38_v37, %v37_v36  ;;  %v35_v48 = vld [vmem:[%s957_s0 + $0x30] sm:$0xff]  ;;  %587 = vset.pattern.permute.xlu1 %v675_v7  ;;  %vm331_vm1 = vcmask 261120   ;;  %vm520_vm14 = vcmask 1040384   ;;  %vm522_vm15 = vcmask 1041408  }
  0x10   :  { %v162_v33 = vsel %vm139_vm0, %v82_v30, 0  ;;  %v186_v34 = vsel %vm139_vm0, %v90_v31, 0  ;;  %v210_v35 = vsel %vm139_vm0, %v98_v32, 0  ;;  %v69_v40 = vld [vmem:[%s957_s0 + $0x140] sm:$0xff]  ;;  %v70_v41 = vld [vmem:[%s957_s0 + $0x148] sm:$0xff]  ;;  %v89_v43 = vpack.c.bf16 %v54_v39, %v53_v38  ;;  %v36_v49 = vld [vmem:[%s957_s0 + $0x38] sm:$0xff]  ;;  %586 = vset.pattern.permute.xlu0 %v675_v7  ;;  %588 = vset.pattern.permute.xlu2 %v675_v7 }
  0x11   :  { %v97_v44 = vpack.c.bf16 %v70_v41, %v69_v40  ;;  %v159_v45 = vsel %vm139_vm0, %v81_v42, 0  ;;  %v51_v50 = vld [vmem:[%s957_s0 + $0xb0] sm:$0xff]  ;;  %v52_v51 = vld [vmem:[%s957_s0 + $0xb8] sm:$0xff]  ;;  %v80_v54 = vpack.c.bf16 %v36_v49, %v35_v48  ;;  %v33_v60 = vld [vmem:[%s957_s0 + $0x20] sm:$0xff] }
  0x12   :  { %v183_v46 = vsel %vm139_vm0, %v89_v43, 0  ;;  %v67_v52 = vld [vmem:[%s957_s0 + $0x130] sm:$0xff]  ;;  %v68_v53 = vld [vmem:[%s957_s0 + $0x138] sm:$0xff]  ;;  %v88_v55 = vpack.c.bf16 %v52_v51, %v51_v50  ;;  %v34_v61 = vld [vmem:[%s957_s0 + $0x28] sm:$0xff] }
  0x13   :  { %v207_v47 = vsel %vm139_vm0, %v97_v44, 0  ;;  %v96_v56 = vpack.c.bf16 %v68_v53, %v67_v52  ;;  %v156_v57 = vsel %vm139_vm0, %v80_v54, 0  ;;  %v49_v62 = vld [vmem:[%s957_s0 + $0xa0] sm:$0xff]  ;;  %v50_v63 = vld [vmem:[%s957_s0 + $0xa8] sm:$0xff]  ;;  %v107_v2 = vld [vmem:[%s959_s2 + $0x10] sm:$0xff]  ;;  %v79_v4 = vpack.c.bf16 %v34_v61, %v33_v60 }
  0x14   :  { %v180_v58 = vsel %vm139_vm0, %v88_v55, 0  ;;  %v65_v0 = vld [vmem:[%s957_s0 + $0x120] sm:$0xff]  ;;  %v66_v1 = vld [vmem:[%s957_s0 + $0x128] sm:$0xff]  ;;  %v87_v5 = vpack.c.bf16 %v50_v63, %v49_v62  ;;  %121 = vperm.xlu0 %586, %v107_v2   ;;  %v31_v11 = vld [vmem:[%s957_s0 + $0x10] sm:$0xff] }
  0x15   :  { %220 = vmatpush.bf16.xpose.msra.mxu0 %v162_v33  ;;  %v204_v59 = vsel %vm139_vm0, %v96_v56, 0  ;;  %v105_v3 = vld [vmem:[%s959_s2] sm:$0xff]  ;;  %v95_v6 = vpack.c.bf16 %v66_v1, %v65_v0  ;;  %v153_v8 = vsel %vm139_vm0, %v79_v4, 0  ;;  %v32_v12 = vld [vmem:[%s957_s0 + $0x18] sm:$0xff]  ;;  %v47_v13 = vld [vmem:[%s957_s0 + $0x90] sm:$0xff] }
  0x16   :  { %239 = vmatpush.bf16.xpose.msra.mxu1 %v186_v34  ;;  %111 = vperm.xlu1 %587, %v105_v3   ;;  %v177_v9 = vsel %vm139_vm0, %v87_v5, 0  ;;  %v48_v14 = vld [vmem:[%s957_s0 + $0x98] sm:$0xff]  ;;  %v63_v15 = vld [vmem:[%s957_s0 + $0x110] sm:$0xff]  ;;  %v78_v17 = vpack.c.bf16 %v32_v12, %v31_v11  ;;  %v29_v23 = vld [vmem:[%s957_s0] sm:$0xff] }
  0x17   :  { %258 = vmatpush.bf16.xpose.msra.mxu2 %v210_v35  ;;  %v201_v10 = vsel %vm139_vm0, %v95_v6, 0  ;;  %v64_v16 = vld [vmem:[%s957_s0 + $0x118] sm:$0xff]  ;;  %v86_v18 = vpack.c.bf16 %v48_v14, %v47_v13  ;;  %v30_v24 = vld [vmem:[%s957_s0 + $0x8] sm:$0xff]  ;;  %v45_v25 = vld [vmem:[%s957_s0 + $0x80] sm:$0xff] }
  0x18   :  { %v94_v19 = vpack.c.bf16 %v64_v16, %v63_v15  ;;  %v150_v20 = vsel %vm139_vm0, %v78_v17, 0  ;;  %v46_v26 = vld [vmem:[%s957_s0 + $0x88] sm:$0xff]  ;;  %v61_v27 = vld [vmem:[%s957_s0 + $0x100] sm:$0xff]  ;;  %v108_v29 = vld [vmem:[%s959_s2 + $0x18] sm:$0xff]  ;;  %v77_v31 = vpack.c.bf16 %v30_v24, %v29_v23 }
  0x19   :  { %v174_v21 = vsel %vm139_vm0, %v86_v18, 0  ;;  %v62_v28 = vld [vmem:[%s957_s0 + $0x108] sm:$0xff]  ;;  %v85_v32 = vpack.c.bf16 %v46_v26, %v45_v25  ;;  %v297_v37 = vld [vmem:[%s961_s4] sm:$0xff]  ;;  %v299_v25 = vld [vmem:[%s961_s4 + $0x10] sm:$0xff] }
  0x1a   :  { %v198_v22 = vsel %vm139_vm0, %v94_v19, 0  ;;  %v106_v30 = vld [vmem:[%s959_s2 + $0x8] sm:$0xff]  ;;  %v93_v33 = vpack.c.bf16 %v62_v28, %v61_v27  ;;  %v147_v34 = vsel %vm139_vm0, %v77_v31, 0  ;;  %v580_v39 = vld [vmem:[%s958_s1] sm:$0xff]  ;;  %313 = vperm.xlu2 %588, %v299_v25   ;;  %v300_v26 = vld [vmem:[%s961_s4 + $0x18] sm:$0xff] }
  0x1b   :  { %v171_v35 = vsel %vm139_vm0, %v85_v32, 0  ;;  %v298_v38 = vld [vmem:[%s961_s4 + $0x8] sm:$0xff]  ;;  %v582_v15 = vld [vmem:[%s960_s3] sm:$0xff] }
  0x1c   :  { %126 = vperm.xlu0 %586, %v108_v29   ;;  %v195_v36 = vsel %vm139_vm0, %v93_v33, 0  ;;  %v581_v40 = vld [vmem:[%s958_s1 + $0x8] sm:$0xff] }
  0x1d   :  { %221 = vmatpush.bf16.xpose.msra.mxu0 %v159_v45  ;;  %v583_v24 = vld [vmem:[%s960_s3 + $0x8] sm:$0xff] }
  0x1e   :  { %240 = vmatpush.bf16.xpose.msra.mxu1 %v183_v46  ;;  %116 = vperm.xlu1 %587, %v106_v30  }
  0x1f   :  { %259 = vmatpush.bf16.xpose.msra.mxu2 %v207_v47 }
  0x22   :  { %318 = vperm.xlu2 %588, %v300_v26  }
  0x24   :  { %303 = vperm.xlu0 %586, %v297_v37  }
  0x25   :  { %222 = vmatpush.bf16.xpose.msra.mxu0 %v156_v57 }
  0x26   :  { %241 = vmatpush.bf16.xpose.msra.mxu1 %v180_v58  ;;  %308 = vperm.xlu1 %587, %v298_v38  }
  0x27   :  { %260 = vmatpush.bf16.xpose.msra.mxu2 %v204_v59 }
  0x2d   :  { %223 = vmatpush.bf16.xpose.msra.mxu0 %v153_v8 }
  0x2e   :  { %242 = vmatpush.bf16.xpose.msra.mxu1 %v177_v9 }
  0x2f   :  { %261 = vmatpush.bf16.xpose.msra.mxu2 %v201_v10 }
  0x35   :  { %224 = vmatpush.bf16.xpose.msra.mxu0 %v150_v20 }
  0x36   :  { %243 = vmatpush.bf16.xpose.msra.mxu1 %v174_v21 }
  0x37   :  { %262 = vmatpush.bf16.xpose.msra.mxu2 %v198_v22 }
  0x3d   :  { %225 = vmatpush.bf16.xpose.msra.mxu0 %v147_v34 }
  0x3e   :  { %244 = vmatpush.bf16.xpose.msra.mxu1 %v171_v35 }
  0x3f   :  { %263 = vmatpush.bf16.xpose.msra.mxu2 %v195_v36 }
  0x44   :  { %554 = vmatmul.msk.bf16.vlgmr.msra.gmra.mxu0 %vm139_vm0, %v580_v39 }
  0x45   :  { %556 = vmatmul.msk.bf16.vlgmr.msra.gmra.mxu1 %vm139_vm0, %v580_v39 }
  0x46   :  { %558 = vmatmul.msk.bf16.vlgmr.msra.gmra.mxu2 %vm139_vm0, %v580_v39 }
  0x54   :  { %555 = vmatmul.msk.bf16.gmra.mxu0 %vm139_vm0, %v581_v40 }
  0x55   :  { %557 = vmatmul.msk.bf16.gmra.mxu1 %vm139_vm0, %v581_v40 }
  0x56   :  { %559 = vmatmul.msk.bf16.gmra.mxu2 %vm139_vm0, %v581_v40 }
  0x74   :  { %v314_v29 = vpop.permute.xlu2 %313 }
  0x7c   :  { %v319_v32 = vpop.permute.xlu2 %318 }
  0x86   :  { %v122_v47 = vpop.permute.xlu0 %121 }
  0x88   :  { %v112_v46 = vpop.permute.xlu1 %111 }
  0x8e   :  { %v127_v54 = vpop.permute.xlu0 %126 }
  0x90   :  { %v117_v51 = vpop.permute.xlu1 %116 }
  0x96   :  { %v304_v37 = vpop.permute.xlu0 %303 }
  0x98   :  { %v309_v33 = vpop.permute.xlu1 %308 }
  0xc1   :  { %v227_v41 = vpop.f32.mrf.mxu0 }
  0xc2   :  { %v246_v42 = vpop.f32.mrf.mxu1  ;;  %v228_v60 = vadd.f32 %v227_v41, %v112_v46 }
  0xc3   :  { %v247_v62 = vadd.f32 %v246_v42, %v112_v46 }
  0xc9   :  { %v265_v43 = vpop.f32.mrf.mxu2  ;;  %v229_v44 = vpop.f32.mrf.mxu0 }
  0xca   :  { %v248_v45 = vpop.f32.mrf.mxu1  ;;  %v230_v56 = vadd.f32 %v229_v44, %v117_v51  ;;  %v266_v5 = vadd.f32 %v265_v43, %v112_v46 }
  0xcb   :  { %v249_v63 = vadd.f32 %v248_v45, %v117_v51 }
  0xd1   :  { %v267_v48 = vpop.f32.mrf.mxu2  ;;  %v232_v49 = vpop.f32.mrf.mxu0 }
  0xd2   :  { %v251_v50 = vpop.f32.mrf.mxu1  ;;  %v233_v52 = vadd.f32 %v232_v49, %v122_v47  ;;  %v268_v8 = vadd.f32 %v267_v48, %v117_v51 }
  0xd3   :  { %v252_v61 = vadd.f32 %v251_v50, %v122_v47 }
  0xd4   :  { %589 = vtanh.f32 %v233_v52 }
  0xd9   :  { %v270_v53 = vpop.f32.mrf.mxu2  ;;  %v234_v55 = vpop.f32.mrf.mxu0 }
  0xda   :  { %v235_v57 = vadd.f32 %v234_v55, %v127_v54  ;;  %v253_v58 = vpop.f32.mrf.mxu1  ;;  %v590_v1 = vpop.eup %589  ;;  %v271_v4 = vadd.f32 %v270_v53, %v122_v47 }
  0xdb   :  { %v254_v59 = vadd.f32 %v253_v58, %v127_v54  ;;  %v407_v58 = vld [vmem:[%s962_s5] sm:$0x1] }
  0xdc   :  { %591 = vtanh.f32 %v235_v57 }
  0xdd   :  { %593 = vtanh.f32 %v230_v56 }
  0xde   :  { %595 = vtanh.f32 %v254_v59 }
  0xdf   :  { %597 = vtanh.f32 %v228_v60 }
  0xe0   :  { %599 = vtanh.f32 %v252_v61 }
  0xe1   :  { %v272_v0 = vpop.f32.mrf.mxu2  ;;  %601 = vtanh.f32 %v247_v62 }
  0xe2   :  { %v273_v2 = vadd.f32 %v272_v0, %v127_v54  ;;  %v592_v3 = vpop.eup %591  ;;  %603 = vtanh.f32 %v249_v63 }
  0xe3   :  { %v294_v6 = vpack.c.bf16 %v592_v3, %v590_v1  ;;  %v594_v7 = vpop.eup %593 }
  0xe4   :  { %605 = vtanh.f32 %v273_v2  ;;  %v596_v9 = vpop.eup %595 }
  0xe5   :  { %344 = vmatpush.bf16.msra.mxu3 %v294_v6  ;;  %v598_v10 = vpop.eup %597  ;;  %607 = vtanh.f32 %v271_v4 }
  0xe6   :  { %v600_v11 = vpop.eup %599  ;;  %609 = vtanh.f32 %v266_v5  ;;  %v291_v12 = vpack.c.bf16 %v594_v7, %v598_v10 }
  0xe7   :  { %v602_v13 = vpop.eup %601  ;;  %611 = vtanh.f32 %v268_v8  ;;  %v295_v14 = vpack.c.bf16 %v596_v9, %v600_v11 }
  0xe8   :  { %v604_v16 = vpop.eup %603 }
  0xe9   :  { %345 = vmatpush.bf16.msra.mxu3 %v291_v12  ;;  %v292_v19 = vpack.c.bf16 %v604_v16, %v602_v13 }
  0xea   :  { %v606_v17 = vpop.eup %605 }
  0xeb   :  { %v608_v18 = vpop.eup %607 }
  0xec   :  { %568 = vmatmul.msk.bf16.vlgmr.msra.gmra.mxu3 %vm331_vm1, %v582_v15  ;;  %v610_v20 = vpop.eup %609  ;;  %v296_v21 = vpack.c.bf16 %v606_v17, %v608_v18 }
  0xed   :  { %363 = vmatpush.bf16.msrb.mxu3 %v295_v14  ;;  %v612_v22 = vpop.eup %611  ;;  %v415_v14 = vstv %s963_s6  ;;  %s676_s6 = smov [#allocation3]  }
  0xee   :  { %v293_v23 = vpack.c.bf16 %v612_v22, %v610_v20  ;;  %s535_s27 = sshll.u32 %s676_s6, 4  ;;  %s536_s27 = int_to_ptr.vmem [resolvable:$true] %s535_s27 }
  0xf1   :  { %364 = vmatpush.bf16.msrb.mxu3 %v292_v19 }
  0xf5   :  { %382 = vmatpush.bf16.msra.mxu3 %v296_v21 }
  0xf9   :  { %383 = vmatpush.bf16.msra.mxu3 %v293_v23 }
  0xfc   :  { %569 = vmatmul.msk.bf16.gmra.mxu3 %vm331_vm1, %v583_v24 }
 0x10c   :  { %570 = vmatmul.msk.bf16.vlgmr.msrb.gmra.mxu3 %vm331_vm1, %v582_v15 }
 0x11c   :  { %571 = vmatmul.msk.bf16.gmra.mxu3 %vm331_vm1, %v583_v24 }
 0x12c   :  { %572 = vmatmul.msk.bf16.vlgmr.msra.gmra.mxu3 %vm331_vm1, %v582_v15 }
 0x13c   :  { %573 = vmatmul.msk.bf16.gmra.mxu3 %vm331_vm1, %v583_v24 }
 0x16f   :  { %v347_v27 = vpop.f32.mrf.mxu3 }
 0x170   :  { %v348_v38 = vadd.f32 %v347_v27, %v304_v37 }
 0x177   :  { %v349_v28 = vpop.f32.mrf.mxu3 }
 0x178   :  { %v350_v35 = vadd.f32 %v349_v28, %v309_v33 }
 0x17f   :  { %v352_v30 = vpop.f32.mrf.mxu3 }
 0x180   :  { %v353_v31 = vadd.f32 %v352_v30, %v314_v29 }
 0x182   :  { %613 = vtanh.f32 %v353_v31 }
 0x187   :  { %v354_v34 = vpop.f32.mrf.mxu3 }
 0x188   :  { %v355_v36 = vadd.f32 %v354_v34, %v319_v32  ;;  %v614_v39 = vpop.eup %613 }
 0x18a   :  { %615 = vtanh.f32 %v355_v36 }
 0x18b   :  { %617 = vtanh.f32 %v350_v35 }
 0x18c   :  { %619 = vtanh.f32 %v348_v38 }
 0x18f   :  { %v366_v40 = vpop.f32.mrf.mxu3 }
 0x190   :  { %v616_v41 = vpop.eup %615  ;;  %v367_v52 = vadd.f32 %v366_v40, %v304_v37 }
 0x191   :  { %v411_v42 = vpack.c.bf16 %v616_v41, %v614_v39  ;;  %v618_v43 = vpop.eup %617 }
 0x192   :  { %v620_v44 = vpop.eup %619 }
 0x193   :  { %425 = vmatpush.bf16.msrb.mxu0 %v411_v42  ;;  %v408_v45 = vpack.c.bf16 %v618_v43, %v620_v44 }
 0x197   :  { %v368_v46 = vpop.f32.mrf.mxu3  ;;  %426 = vmatpush.bf16.msrb.mxu0 %v408_v45 }
 0x198   :  { %v369_v50 = vadd.f32 %v368_v46, %v309_v33 }
 0x19a   :  { %574 = vmatmul.msk.bf16.vlgmr.msrb.gmra.mxu0 %vm331_vm1, %v407_v58 }
 0x19f   :  { %v371_v47 = vpop.f32.mrf.mxu3 }
 0x1a0   :  { %v372_v48 = vadd.f32 %v371_v47, %v314_v29 }
 0x1a2   :  { %621 = vtanh.f32 %v372_v48 }
 0x1a7   :  { %v373_v49 = vpop.f32.mrf.mxu3 }
 0x1a8   :  { %v374_v51 = vadd.f32 %v373_v49, %v319_v32  ;;  %v622_v53 = vpop.eup %621 }
 0x1aa   :  { %623 = vtanh.f32 %v374_v51 }
 0x1ab   :  { %625 = vtanh.f32 %v369_v50 }
 0x1ac   :  { %627 = vtanh.f32 %v367_v52 }
 0x1af   :  { %v385_v54 = vpop.f32.mrf.mxu3 }
 0x1b0   :  { %v624_v55 = vpop.eup %623  ;;  %v386_v60 = vadd.f32 %v385_v54, %v304_v37 }
 0x1b1   :  { %v412_v56 = vpack.c.bf16 %v624_v55, %v622_v53  ;;  %v626_v57 = vpop.eup %625 }
 0x1b2   :  { %v628_v59 = vpop.eup %627  ;;  %629 = vtanh.f32 %v386_v60 }
 0x1b3   :  { %438 = vmatpush.bf16.msrb.mxu1 %v412_v56  ;;  %v409_v61 = vpack.c.bf16 %v626_v57, %v628_v59  ;;  %v525_v57 = vlaneseq }
 0x1b5   :  { %vm527_vm0 = vcmp.lt.s32.totalorder %v525_v57, 384 }
 0x1b7   :  { %v387_v62 = vpop.f32.mrf.mxu3  ;;  %439 = vmatpush.bf16.msrb.mxu1 %v409_v61 }
 0x1b8   :  { %v388_v63 = vadd.f32 %v387_v62, %v309_v33  ;;  %v630_v0 = vpop.eup %629 }
 0x1ba   :  { %631 = vtanh.f32 %v388_v63  ;;  %575 = vmatmul.msk.bf16.vlgmr.msrb.gmra.mxu1 %vm331_vm1, %v407_v58 }
 0x1bf   :  { %v390_v1 = vpop.f32.mrf.mxu3 }
 0x1c0   :  { %v632_v2 = vpop.eup %631  ;;  %v391_v4 = vadd.f32 %v390_v1, %v314_v29 }
 0x1c1   :  { %v410_v3 = vpack.c.bf16 %v632_v2, %v630_v0 }
 0x1c2   :  { %633 = vtanh.f32 %v391_v4 }
 0x1c7   :  { %v392_v5 = vpop.f32.mrf.mxu3 }
 0x1c8   :  { %v393_v6 = vadd.f32 %v392_v5, %v319_v32  ;;  %v634_v7 = vpop.eup %633 }
 0x1ca   :  { %635 = vtanh.f32 %v393_v6 }
 0x1d0   :  { %v636_v8 = vpop.eup %635 }
 0x1d1   :  { %v413_v9 = vpack.c.bf16 %v636_v8, %v634_v7 }
 0x1d3   :  { %451 = vmatpush.bf16.msrb.mxu2 %v413_v9 }
 0x1d7   :  { %452 = vmatpush.bf16.msrb.mxu2 %v410_v3 }
 0x1da   :  { %576 = vmatmul.msk.bf16.vlgmr.msrb.gmra.mxu2 %vm331_vm1, %v407_v58 }
 0x217   :  { %v428_v10 = vpop.f32.mrf.mxu0 }
 0x218   :  { %v429_v17 = vadd.f32 %v428_v10, %v415_v14 }
 0x21a   :  { %v577_v18 = vmul.f32 -1.442695, %v429_v17 }
 0x21f   :  { %v430_v12 = vpop.f32.mrf.mxu0 }
 0x237   :  { %v441_v11 = vpop.f32.mrf.mxu1 }
 0x238   :  { %v442_v15 = vadd.f32 %v441_v11, %v415_v14 }
 0x23a   :  { %v578_v16 = vmul.f32 -1.442695, %v442_v15 }
 0x23c   :  { %637 = vpow2.f32 %v578_v16 }
 0x23d   :  { %639 = vpow2.f32 %v577_v18 }
 0x23f   :  { %v443_v13 = vpop.f32.mrf.mxu1 }
 0x242   :  { %v638_v19 = vpop.eup %637 }
 0x243   :  { %v468_v20 = vadd.f32 1.0, %v638_v19  ;;  %v640_v21 = vpop.eup %639 }
 0x244   :  { %v467_v22 = vadd.f32 1.0, %v640_v21 }
 0x245   :  { %641 = vrcp.f32 %v468_v20  ;;  %vm490_vm2 = vweird.f32 %v468_v20  ;;  %v496_v36 = vand.u32 2147483648, %v468_v20  ;;  %v494_v39 = vand.u32 2147483647, %v468_v20 }
 0x246   :  { %643 = vrcp.f32 %v467_v22  ;;  %vm475_vm5 = vweird.f32 %v467_v22  ;;  %v481_v42 = vand.u32 2147483648, %v467_v22  ;;  %v479_v46 = vand.u32 2147483647, %v467_v22 }
 0x247   :  { %v497_v44 = vor.u32 1.1754944e-38, %v496_v36  ;;  %vm495_vm7 = vcmp.eq.f32.partialorder %v494_v39, 8.507059e+37 }
 0x248   :  { %v482_v50 = vor.u32 1.1754944e-38, %v481_v42  ;;  %vm480_vm10 = vcmp.eq.f32.partialorder %v479_v46, 8.507059e+37 }
 0x24b   :  { %v642_v25 = vpop.eup %641 }
 0x24c   :  { %v486_v27 = vmul.f32 %v642_v25, %v468_v20  ;;  %v644_v28 = vpop.eup %643  ;;  %vm491_vm3 = vweird.f32 %v642_v25 }
 0x24d   :  { %v471_v31 = vmul.f32 %v644_v28, %v467_v22  ;;  %vm942_vm4 = vmor %vm490_vm2, %vm491_vm3  ;;  %vm476_vm6 = vweird.f32 %v644_v28 }
 0x24e   :  { %v487_v30 = vsub.f32 1.0, %v486_v27  ;;  %vm948_vm8 = vmor %vm475_vm5, %vm476_vm6 }
 0x24f   :  { %v472_v35 = vsub.f32 1.0, %v471_v31 }
 0x250   :  { %v488_v34 = vmul.f32 %v642_v25, %v487_v30 }
 0x251   :  { %v473_v37 = vmul.f32 %v644_v28, %v472_v35 }
 0x252   :  { %v489_v38 = vadd.f32 %v642_v25, %v488_v34 }
 0x253   :  { %v474_v45 = vadd.f32 %v644_v28, %v473_v37 }
 0x254   :  { %v493_v47 = vsel %vm942_vm4, %v642_v25, %v489_v38 }
 0x255   :  { %v498_v52 = vsel %vm495_vm7, %v497_v44, %v493_v47  ;;  %v478_v55 = vsel %vm948_vm8, %v644_v28, %v474_v45 }
 0x256   :  { %v518_v59 = vrot.slane %v498_v52, 7  ;;  %v483_v60 = vsel %vm480_vm10, %v482_v50, %v478_v55 }
 0x258   :  { %v521_v0 = vsel %vm520_vm14, %v483_v60, %v518_v59 }
 0x25d   :  { %v454_v23 = vpop.f32.mrf.mxu2 }
 0x25e   :  { %v455_v24 = vadd.f32 %v454_v23, %v415_v14 }
 0x260   :  { %v579_v26 = vmul.f32 -1.442695, %v455_v24 }
 0x262   :  { %645 = vpow2.f32 %v579_v26 }
 0x265   :  { %v456_v29 = vpop.f32.mrf.mxu2 }
 0x268   :  { %v646_v32 = vpop.eup %645 }
 0x269   :  { %v469_v33 = vadd.f32 1.0, %v646_v32 }
 0x26b   :  { %647 = vrcp.f32 %v469_v33  ;;  %v511_v51 = vand.u32 2147483648, %v469_v33  ;;  %v509_v54 = vand.u32 2147483647, %v469_v33  ;;  %vm505_vm11 = vweird.f32 %v469_v33 }
 0x26d   :  { %v512_v58 = vor.u32 1.1754944e-38, %v511_v51  ;;  %vm510_vm13 = vcmp.eq.f32.partialorder %v509_v54, 8.507059e+37 }
 0x271   :  { %v648_v41 = vpop.eup %647 }
 0x272   :  { %v501_v43 = vmul.f32 %v648_v41, %v469_v33  ;;  %vm506_vm9 = vweird.f32 %v648_v41 }
 0x273   :  { %vm507_vm12 = vmor %vm505_vm11, %vm506_vm9 }
 0x274   :  { %v502_v48 = vsub.f32 1.0, %v501_v43 }
 0x276   :  { %v503_v53 = vmul.f32 %v648_v41, %v502_v48 }
 0x278   :  { %v504_v56 = vadd.f32 %v648_v41, %v503_v53 }
 0x27a   :  { %v508_v61 = vsel %vm507_vm12, %v648_v41, %v504_v56 }
 0x27b   :  { %v513_v62 = vsel %vm510_vm13, %v512_v58, %v508_v61 }
 0x27c   :  { %v519_v63 = vrot.slane %v513_v62, 6 }
 0x27e   :  { %v523_v1 = vsel %vm522_vm15, %v521_v0, %v519_v63 }
 0x27f   :  { %529 = vst.msk [vmem:[#allocation3] sm:$0x7] %vm527_vm0, %v523_v1 }
 0x280   :  { %540 = dma.vmem_to_hbm [thread:$0]  %s536_s27, 48, %s538_s30, [#allocation4]  }
 0x281   :  { %673 = dma.done.wait [#allocation4], 48  }
 0x282   :  { %674 = vsyncadd [#allocation4], 4294967248 }
 0x283   :  { %545 = vsyncpa [#allocation4], 1 }

</bundles_post_ra>
